<compile_context>
chip_gen: v5e
topology: v5e:2x2
jax: 0.10.0
libtpu: 0.0.40
codegen_flags: <defaults>
</compile_context>

<pallas_src>
import jax
import jax.numpy as jnp
from jax import lax
from jax.experimental import pallas as pl
from jax.experimental.pallas import tpu as pltpu

LANE = 128  # pad feature dims to full vreg lane width


# ----------------------------------------------------------------------------
# glue: NCHW image -> non-overlapping patch tokens [N, P, C*p*p]
# ----------------------------------------------------------------------------
def patchify(imgs, p):
    N, C, H, W = imgs.shape
    x = imgs.reshape(N, C, H // p, p, W // p, p)
    x = jnp.transpose(x, (0, 2, 4, 1, 3, 5))          # [N, Hp, Wp, C, p, p]
    return x.reshape(N, (H // p) * (W // p), C * p * p)


def _round_up(x, m):
    return ((x + m - 1) // m) * m


def _pad_last(x, target):
    pad = target - x.shape[-1]
    if pad <= 0:
        return x
    cfg = [(0, 0)] * (x.ndim - 1) + [(0, pad)]
    return jnp.pad(x, cfg)


# ----------------------------------------------------------------------------
# Fused kernel: backbone -> prototypes -> cosine patch classifier
# ----------------------------------------------------------------------------
def make_protonet_kernel(nSupp, nQry, nC, P):
    S = nSupp * P          # support patch rows
    M = nQry               # number of queries
    Q = nQry * P           # query patch rows
    TOPK = min(5, P)
    eps = 1e-12

    def kernel(tok_ref, w_ref, b_ref, oh_ref, sb_ref, o_ref):
        # ---- backbone: all (support + query) tokens in ONE MXU matmul ----
        emb = jnp.dot(tok_ref[...], w_ref[...],
                      preferred_element_type=jnp.float32) + b_ref[...]
        supp = emb[:S, :]                                     # [nSupp*P, d]
        qry = emb[S:, :]                                      # [nQry*P,  d]

        # ---- prototypes: (one_hot/cnt  kron  I_P) @ supp  (per-patch avg) ----
        proto = jnp.dot(oh_ref[...], supp,
                        preferred_element_type=jnp.float32)   # [nC*P, d]

        # ---- L2 normalize (rsqrt -> EUP; eps clamp matches F.normalize) ----
        sn = proto * lax.rsqrt(
            jnp.maximum(jnp.sum(proto * proto, axis=-1, keepdims=True), eps * eps))
        qn = qry * lax.rsqrt(
            jnp.maximum(jnp.sum(qry * qry, axis=-1, keepdims=True), eps * eps))

        # ---- all-pairs patch similarity in ONE MXU op (all queries) ----
        # sim[c*P + ps, m*P + pq] = <proto patch ps of class c, query patch pq of m>
        sim = lax.dot_general(sn, qn, (((1,), (1,)), ((), ())),
                              preferred_element_type=jnp.float32)   # [nC*P, Q]

        # per (class, query-patch): max over the class's P prototype patches.
        # Sublane split by P (multiple of 8) -> layout-clean reshape + one reduce.
        vmax = jnp.max(sim.reshape(nC, P, Q), axis=1)               # [nC, Q]

        # ---- top-K sum per (query, class) ----
        # Only the cheap top-K extraction stays in this tiny static unroll;
        # switch to a grid axis / fori_loop if M grows beyond a handful.
        iota = lax.broadcasted_iota(jnp.int32, (nC, P), 1)
        cols = []
        for m in range(M):
            v = vmax[:, m * P:(m + 1) * P]                          # [nC, P]
            tot = jnp.zeros((nC, 1), jnp.float32)
            for _ in range(TOPK):     # duplicate-safe iterative max extraction
                cur = jnp.max(v, axis=1, keepdims=True)             # [nC, 1]
                tot = tot + cur
                first = jnp.min(jnp.where(v == cur, iota, P),
                                axis=1, keepdims=True)
                v = jnp.where(iota == first, -jnp.inf, v)
            cols.append(tot)
        res = jnp.concatenate(cols, axis=1)                         # [nC, M]

        # [nC, M] -> [M, nC] with a tiny MXU identity matmul (no XLU transpose)
        eye_m = (lax.broadcasted_iota(jnp.int32, (M, M), 0)
                 == lax.broadcasted_iota(jnp.int32, (M, M), 1)).astype(jnp.float32)
        out = lax.dot_general(eye_m, res, (((1,), (1,)), ((), ())),
                              preferred_element_type=jnp.float32)   # [M, nC]

        scale = sb_ref[0]
        bias = sb_ref[1]
        o_ref[...] = scale * (out + bias)                           # single store

    return kernel


# ----------------------------------------------------------------------------
# Full ProtoNet forward (host glue + one fused pallas_call)
# ----------------------------------------------------------------------------
def protonet_forward(params, supp_x, supp_y, x, num_classes=5):
    B, nSupp, C, H, W = supp_x.shape
    nQry = x.shape[1]
    # The PyTorch forward hard-codes prototypes.view(5, patch_num, -1) => B==1, nC==5
    assert B == 1 and num_classes == 5
    p = params["patch"]
    d = params["w"].shape[1]

    # Backbone runs ONCE on support + query tokens concatenated.
    supp_tok = patchify(supp_x.reshape(-1, C, H, W), p)       # [nSupp, P, Dp]
    qry_tok = patchify(x.reshape(-1, C, H, W), p)             # [nQry,  P, Dp]
    P, Dp = supp_tok.shape[1], supp_tok.shape[2]

    # Zero-pad feature dims to full lane width (exact: padding contributes 0).
    Dpad = _round_up(Dp, LANE)
    dpad = _round_up(d, LANE)
    tok = jnp.concatenate(
        [supp_tok.reshape(nSupp * P, Dp), qry_tok.reshape(nQry * P, Dp)], axis=0)
    tok = _pad_last(tok, Dpad)                                        # [(nS+nQ)*P, Dpad]
    w = _pad_last(jnp.pad(params["w"], ((0, Dpad - Dp), (0, 0))), dpad)  # [Dpad, dpad]
    b = _pad_last(params["b"], dpad)                                  # [1, dpad]

    # one-hot with 1/count folded in, expanded per patch: kron(oh/cnt, I_P)
    onehot = jnp.transpose(
        jax.nn.one_hot(supp_y, num_classes, dtype=jnp.float32), (0, 2, 1))[0]  # [nC, nSupp]
    cnt = jnp.sum(onehot, axis=1, keepdims=True)
    inv_cnt = jnp.where(cnt > 0, 1.0 / cnt, 0.0)      # guard empty classes
    oh_kron = jnp.kron(onehot * inv_cnt,
                       jnp.eye(P, dtype=jnp.float32))                 # [nC*P, nSupp*P]

    sb = jnp.array([params["scale_cls"], params["bias"]], dtype=jnp.float32)

    kernel = make_protonet_kernel(nSupp, nQry, num_classes, P)
    out = pl.pallas_call(
        kernel,
        out_shape=jax.ShapeDtypeStruct((nQry, num_classes), jnp.float32),
        in_specs=[
            pl.BlockSpec(memory_space=pltpu.MemorySpace.VMEM),   # tokens
            pl.BlockSpec(memory_space=pltpu.MemorySpace.VMEM),   # backbone weight
            pl.BlockSpec(memory_space=pltpu.MemorySpace.VMEM),   # backbone bias
            pl.BlockSpec(memory_space=pltpu.MemorySpace.VMEM),   # kron(one_hot/cnt, I_P)
            pl.BlockSpec(memory_space=pltpu.MemorySpace.SMEM),   # (scale_cls, bias)
        ],
        out_specs=pl.BlockSpec(memory_space=pltpu.MemorySpace.VMEM),
    )(tok, w, b, oh_kron, sb)
    return out[None]                                                  # [1, M, nC]


# ----------------------------------------------------------------------------
# Pure-JAX reference (semantics of the PyTorch module)
# ----------------------------------------------------------------------------
def _l2norm(v, eps=1e-12):
    n = jnp.sqrt(jnp.sum(v * v, axis=-1, keepdims=True))
    return v / jnp.maximum(n, eps)


def ref_forward(params, supp_x, supp_y, x, num_classes=5):
    B, nSupp, C, H, W = supp_x.shape
    nC = num_classes

    def backbone(imgs):
        toks = patchify(imgs, params["patch"])
        return toks @ params["w"] + params["b"][0]

    supp_f = backbone(supp_x.reshape(-1, C, H, W))
    P = supp_f.shape[1]
    supp_f = supp_f.reshape(B, nSupp, -1)
    oh = jnp.transpose(jax.nn.one_hot(supp_y, nC, dtype=jnp.float32), (0, 2, 1))
    proto = jnp.einsum("bcs,bsd->bcd", oh, supp_f) / jnp.sum(oh, 2, keepdims=True)
    proto = proto.reshape(nC, P, -1)
    feat = backbone(x.reshape(-1, C, H, W))

    qn, sn = _l2norm(feat), _l2norm(proto)
    sim = jnp.einsum("mpd,cqd->mcpq", qn, sn)
    rowmax = jnp.max(sim, axis=-1)                                  # [M, C, P]
    top5 = jnp.sum(-jnp.sort(-rowmax, axis=-1)[..., : min(5, P)], axis=-1)
    return (params["scale_cls"] * (top5 + params["bias"]))[None]    # [1, M, C]


# ----------------------------------------------------------------------------
if __name__ == "__main__":
    key = jax.random.PRNGKey(0)
    B, nSupp, nQry, C, H, W = 1, 5, 2, 4, 16, 16
    patch, d = 4, 32
    Dp = C * patch * patch
    k1, k2, k3, k4 = jax.random.split(key, 4)

    params = dict(
        patch=patch,
        w=jax.random.normal(k1, (Dp, d), jnp.float32) * 0.05,       # backbone proj weight
        b=jax.random.normal(k2, (1, d), jnp.float32) * 0.01,        # backbone proj bias
        scale_cls=10.0,                                             # nn.Parameter fill_(10)
        bias=0.0,                                                   # nn.Parameter fill_(0)
    )

    supp_x = jax.random.normal(k3, (B, nSupp, C, H, W), jnp.float32)
    x = jax.random.normal(k4, (B, nQry, C, H, W), jnp.float32)
    supp_y = jnp.arange(nSupp, dtype=jnp.int32)[None, :]            # classes 0..4

    logits = protonet_forward(params, supp_x, supp_y, x, num_classes=5)
    logits = jax.block_until_ready(logits)

    ref = ref_forward(params, supp_x, supp_y, x, num_classes=5)
    assert logits.shape == (1, B * nQry, 5), logits.shape
    if not jnp.allclose(logits, ref, rtol=1e-3, atol=1e-3):
        raise AssertionError(f"mismatch:\n{logits}\nvs\n{ref}")

    print("KERNEL_OK")
</pallas_src>

<mosaic_0001>
module attributes {stable_mosaic.version = 11 : i64} {
  func.func @kernel(%arg0: memref<112x128xf32, #tpu.memory_space<vmem>>, %arg1: memref<128x128xf32, #tpu.memory_space<vmem>>, %arg2: memref<1x128xf32, #tpu.memory_space<vmem>>, %arg3: memref<80x80xf32, #tpu.memory_space<vmem>>, %arg4: memref<2xf32, #tpu.memory_space<smem>>, %arg5: memref<2x5xf32, #tpu.memory_space<vmem>>) attributes {dimension_semantics = [], scalar_prefetch = 0 : i64, scratch_operands = 0 : i64, tpu.core_type = #tpu.core_type<tc>} {
    %c0 = arith.constant 0 : index
    %c0_0 = arith.constant 0 : index
    %0 = vector.load %arg0[%c0, %c0_0] : memref<112x128xf32, #tpu.memory_space<vmem>>, vector<112x128xf32>
    %c0_1 = arith.constant 0 : index
    %c0_2 = arith.constant 0 : index
    %1 = vector.load %arg1[%c0_1, %c0_2] : memref<128x128xf32, #tpu.memory_space<vmem>>, vector<128x128xf32>
    %cst = arith.constant dense<0.000000e+00> : vector<112x128xf32>
    %2 = tpu.matmul %0, %1, %cst {dimension_numbers = #tpu.dot_dimension_numbers<[1], [0], [0], [1], [0, 0, 1, 1], [], []>} : vector<112x128xf32>, vector<128x128xf32>, vector<112x128xf32> -> vector<112x128xf32>
    %c0_3 = arith.constant 0 : index
    %c0_4 = arith.constant 0 : index
    %3 = vector.load %arg2[%c0_3, %c0_4] : memref<1x128xf32, #tpu.memory_space<vmem>>, vector<1x128xf32>
    %4 = vector.broadcast %3 : vector<1x128xf32> to vector<112x128xf32>
    %5 = arith.addf %2, %4 : vector<112x128xf32>
    %6 = vector.extract_strided_slice %5 {offsets = [0, 0], sizes = [80, 128], strides = [1, 1]} : vector<112x128xf32> to vector<80x128xf32>
    %7 = vector.extract_strided_slice %5 {offsets = [80, 0], sizes = [32, 128], strides = [1, 1]} : vector<112x128xf32> to vector<32x128xf32>
    %c0_5 = arith.constant 0 : index
    %c0_6 = arith.constant 0 : index
    %8 = vector.load %arg3[%c0_5, %c0_6] : memref<80x80xf32, #tpu.memory_space<vmem>>, vector<80x80xf32>
    %cst_7 = arith.constant dense<0.000000e+00> : vector<80x128xf32>
    %9 = tpu.matmul %8, %6, %cst_7 {dimension_numbers = #tpu.dot_dimension_numbers<[1], [0], [0], [1], [0, 0, 1, 1], [], []>} : vector<80x80xf32>, vector<80x128xf32>, vector<80x128xf32> -> vector<80x128xf32>
    %10 = arith.mulf %9, %9 : vector<80x128xf32>
    %cst_8 = arith.constant dense<0.000000e+00> : vector<80xf32>
    %11 = vector.multi_reduction <add>, %10, %cst_8 [1] : vector<80x128xf32> to vector<80xf32>
    %12 = vector.shape_cast %11 : vector<80xf32> to vector<80x1xf32>
    %cst_9 = arith.constant 1.000000e-24 : f32
    %13 = vector.broadcast %cst_9 : f32 to vector<80x1xf32>
    %14 = arith.maximumf %12, %13 : vector<80x1xf32>
    %15 = math.rsqrt %14 : vector<80x1xf32>
    %16 = vector.broadcast %15 : vector<80x1xf32> to vector<80x128xf32>
    %17 = arith.mulf %9, %16 : vector<80x128xf32>
    %18 = arith.mulf %7, %7 : vector<32x128xf32>
    %cst_10 = arith.constant dense<0.000000e+00> : vector<32xf32>
    %19 = vector.multi_reduction <add>, %18, %cst_10 [1] : vector<32x128xf32> to vector<32xf32>
    %20 = vector.shape_cast %19 : vector<32xf32> to vector<32x1xf32>
    %cst_11 = arith.constant 1.000000e-24 : f32
    %21 = vector.broadcast %cst_11 : f32 to vector<32x1xf32>
    %22 = arith.maximumf %20, %21 : vector<32x1xf32>
    %23 = math.rsqrt %22 : vector<32x1xf32>
    %24 = vector.broadcast %23 : vector<32x1xf32> to vector<32x128xf32>
    %25 = arith.mulf %7, %24 : vector<32x128xf32>
    %cst_12 = arith.constant dense<0.000000e+00> : vector<80x32xf32>
    %26 = tpu.matmul %17, %25, %cst_12 {dimension_numbers = #tpu.dot_dimension_numbers<[1], [1], [0], [0], [0, 0, 1, 0], [], []>} : vector<80x128xf32>, vector<32x128xf32>, vector<80x32xf32> -> vector<80x32xf32>
    %27 = vector.shape_cast %26 : vector<80x32xf32> to vector<5x16x32xf32>
    %cst_13 = arith.constant dense<0xFF800000> : vector<5x32xf32>
    %28 = vector.multi_reduction <maximumf>, %27, %cst_13 [1] : vector<5x16x32xf32> to vector<5x32xf32>
    %29 = tpu.iota {dimensions = array<i32: 1>} : vector<5x16xi32>
    %30 = vector.extract_strided_slice %28 {offsets = [0, 0], sizes = [5, 16], strides = [1, 1]} : vector<5x32xf32> to vector<5x16xf32>
    %cst_14 = arith.constant 0.000000e+00 : f32
    %31 = vector.broadcast %cst_14 : f32 to vector<5x1xf32>
    %cst_15 = arith.constant dense<0xFF800000> : vector<5xf32>
    %32 = vector.multi_reduction <maximumf>, %30, %cst_15 [1] : vector<5x16xf32> to vector<5xf32>
    %33 = vector.shape_cast %32 : vector<5xf32> to vector<5x1xf32>
    %34 = arith.addf %31, %33 : vector<5x1xf32>
    %35 = vector.broadcast %33 : vector<5x1xf32> to vector<5x16xf32>
    %36 = arith.cmpf oeq, %30, %35 : vector<5x16xf32>
    %c16_i32 = arith.constant 16 : i32
    %37 = vector.broadcast %c16_i32 : i32 to vector<5x16xi32>
    %38 = arith.select %36, %29, %37 : vector<5x16xi1>, vector<5x16xi32>
    %cst_16 = arith.constant dense<2147483647> : vector<5xi32>
    %39 = vector.multi_reduction <minsi>, %38, %cst_16 [1] : vector<5x16xi32> to vector<5xi32>
    %40 = vector.shape_cast %39 : vector<5xi32> to vector<5x1xi32>
    %41 = vector.broadcast %40 : vector<5x1xi32> to vector<5x16xi32>
    %42 = arith.cmpi eq, %29, %41 : vector<5x16xi32>
    %cst_17 = arith.constant 0xFF800000 : f32
    %43 = vector.broadcast %cst_17 : f32 to vector<5x16xf32>
    %44 = arith.select %42, %43, %30 : vector<5x16xi1>, vector<5x16xf32>
    %cst_18 = arith.constant dense<0xFF800000> : vector<5xf32>
    %45 = vector.multi_reduction <maximumf>, %44, %cst_18 [1] : vector<5x16xf32> to vector<5xf32>
    %46 = vector.shape_cast %45 : vector<5xf32> to vector<5x1xf32>
    %47 = arith.addf %34, %46 : vector<5x1xf32>
    %48 = vector.broadcast %46 : vector<5x1xf32> to vector<5x16xf32>
    %49 = arith.cmpf oeq, %44, %48 : vector<5x16xf32>
    %c16_i32_19 = arith.constant 16 : i32
    %50 = vector.broadcast %c16_i32_19 : i32 to vector<5x16xi32>
    %51 = arith.select %49, %29, %50 : vector<5x16xi1>, vector<5x16xi32>
    %cst_20 = arith.constant dense<2147483647> : vector<5xi32>
    %52 = vector.multi_reduction <minsi>, %51, %cst_20 [1] : vector<5x16xi32> to vector<5xi32>
    %53 = vector.shape_cast %52 : vector<5xi32> to vector<5x1xi32>
    %54 = vector.broadcast %53 : vector<5x1xi32> to vector<5x16xi32>
    %55 = arith.cmpi eq, %29, %54 : vector<5x16xi32>
    %cst_21 = arith.constant 0xFF800000 : f32
    %56 = vector.broadcast %cst_21 : f32 to vector<5x16xf32>
    %57 = arith.select %55, %56, %44 : vector<5x16xi1>, vector<5x16xf32>
    %cst_22 = arith.constant dense<0xFF800000> : vector<5xf32>
    %58 = vector.multi_reduction <maximumf>, %57, %cst_22 [1] : vector<5x16xf32> to vector<5xf32>
    %59 = vector.shape_cast %58 : vector<5xf32> to vector<5x1xf32>
    %60 = arith.addf %47, %59 : vector<5x1xf32>
    %61 = vector.broadcast %59 : vector<5x1xf32> to vector<5x16xf32>
    %62 = arith.cmpf oeq, %57, %61 : vector<5x16xf32>
    %c16_i32_23 = arith.constant 16 : i32
    %63 = vector.broadcast %c16_i32_23 : i32 to vector<5x16xi32>
    %64 = arith.select %62, %29, %63 : vector<5x16xi1>, vector<5x16xi32>
    %cst_24 = arith.constant dense<2147483647> : vector<5xi32>
    %65 = vector.multi_reduction <minsi>, %64, %cst_24 [1] : vector<5x16xi32> to vector<5xi32>
    %66 = vector.shape_cast %65 : vector<5xi32> to vector<5x1xi32>
    %67 = vector.broadcast %66 : vector<5x1xi32> to vector<5x16xi32>
    %68 = arith.cmpi eq, %29, %67 : vector<5x16xi32>
    %cst_25 = arith.constant 0xFF800000 : f32
    %69 = vector.broadcast %cst_25 : f32 to vector<5x16xf32>
    %70 = arith.select %68, %69, %57 : vector<5x16xi1>, vector<5x16xf32>
    %cst_26 = arith.constant dense<0xFF800000> : vector<5xf32>
    %71 = vector.multi_reduction <maximumf>, %70, %cst_26 [1] : vector<5x16xf32> to vector<5xf32>
    %72 = vector.shape_cast %71 : vector<5xf32> to vector<5x1xf32>
    %73 = arith.addf %60, %72 : vector<5x1xf32>
    %74 = vector.broadcast %72 : vector<5x1xf32> to vector<5x16xf32>
    %75 = arith.cmpf oeq, %70, %74 : vector<5x16xf32>
    %c16_i32_27 = arith.constant 16 : i32
    %76 = vector.broadcast %c16_i32_27 : i32 to vector<5x16xi32>
    %77 = arith.select %75, %29, %76 : vector<5x16xi1>, vector<5x16xi32>
    %cst_28 = arith.constant dense<2147483647> : vector<5xi32>
    %78 = vector.multi_reduction <minsi>, %77, %cst_28 [1] : vector<5x16xi32> to vector<5xi32>
    %79 = vector.shape_cast %78 : vector<5xi32> to vector<5x1xi32>
    %80 = vector.broadcast %79 : vector<5x1xi32> to vector<5x16xi32>
    %81 = arith.cmpi eq, %29, %80 : vector<5x16xi32>
    %cst_29 = arith.constant 0xFF800000 : f32
    %82 = vector.broadcast %cst_29 : f32 to vector<5x16xf32>
    %83 = arith.select %81, %82, %70 : vector<5x16xi1>, vector<5x16xf32>
    %cst_30 = arith.constant dense<0xFF800000> : vector<5xf32>
    %84 = vector.multi_reduction <maximumf>, %83, %cst_30 [1] : vector<5x16xf32> to vector<5xf32>
    %85 = vector.shape_cast %84 : vector<5xf32> to vector<5x1xf32>
    %86 = arith.addf %73, %85 : vector<5x1xf32>
    %87 = vector.extract_strided_slice %28 {offsets = [0, 16], sizes = [5, 16], strides = [1, 1]} : vector<5x32xf32> to vector<5x16xf32>
    %cst_31 = arith.constant 0.000000e+00 : f32
    %88 = vector.broadcast %cst_31 : f32 to vector<5x1xf32>
    %cst_32 = arith.constant dense<0xFF800000> : vector<5xf32>
    %89 = vector.multi_reduction <maximumf>, %87, %cst_32 [1] : vector<5x16xf32> to vector<5xf32>
    %90 = vector.shape_cast %89 : vector<5xf32> to vector<5x1xf32>
    %91 = arith.addf %88, %90 : vector<5x1xf32>
    %92 = vector.broadcast %90 : vector<5x1xf32> to vector<5x16xf32>
    %93 = arith.cmpf oeq, %87, %92 : vector<5x16xf32>
    %c16_i32_33 = arith.constant 16 : i32
    %94 = vector.broadcast %c16_i32_33 : i32 to vector<5x16xi32>
    %95 = arith.select %93, %29, %94 : vector<5x16xi1>, vector<5x16xi32>
    %cst_34 = arith.constant dense<2147483647> : vector<5xi32>
    %96 = vector.multi_reduction <minsi>, %95, %cst_34 [1] : vector<5x16xi32> to vector<5xi32>
    %97 = vector.shape_cast %96 : vector<5xi32> to vector<5x1xi32>
    %98 = vector.broadcast %97 : vector<5x1xi32> to vector<5x16xi32>
    %99 = arith.cmpi eq, %29, %98 : vector<5x16xi32>
    %cst_35 = arith.constant 0xFF800000 : f32
    %100 = vector.broadcast %cst_35 : f32 to vector<5x16xf32>
    %101 = arith.select %99, %100, %87 : vector<5x16xi1>, vector<5x16xf32>
    %cst_36 = arith.constant dense<0xFF800000> : vector<5xf32>
    %102 = vector.multi_reduction <maximumf>, %101, %cst_36 [1] : vector<5x16xf32> to vector<5xf32>
    %103 = vector.shape_cast %102 : vector<5xf32> to vector<5x1xf32>
    %104 = arith.addf %91, %103 : vector<5x1xf32>
    %105 = vector.broadcast %103 : vector<5x1xf32> to vector<5x16xf32>
    %106 = arith.cmpf oeq, %101, %105 : vector<5x16xf32>
    %c16_i32_37 = arith.constant 16 : i32
    %107 = vector.broadcast %c16_i32_37 : i32 to vector<5x16xi32>
    %108 = arith.select %106, %29, %107 : vector<5x16xi1>, vector<5x16xi32>
    %cst_38 = arith.constant dense<2147483647> : vector<5xi32>
    %109 = vector.multi_reduction <minsi>, %108, %cst_38 [1] : vector<5x16xi32> to vector<5xi32>
    %110 = vector.shape_cast %109 : vector<5xi32> to vector<5x1xi32>
    %111 = vector.broadcast %110 : vector<5x1xi32> to vector<5x16xi32>
    %112 = arith.cmpi eq, %29, %111 : vector<5x16xi32>
    %cst_39 = arith.constant 0xFF800000 : f32
    %113 = vector.broadcast %cst_39 : f32 to vector<5x16xf32>
    %114 = arith.select %112, %113, %101 : vector<5x16xi1>, vector<5x16xf32>
    %cst_40 = arith.constant dense<0xFF800000> : vector<5xf32>
    %115 = vector.multi_reduction <maximumf>, %114, %cst_40 [1] : vector<5x16xf32> to vector<5xf32>
    %116 = vector.shape_cast %115 : vector<5xf32> to vector<5x1xf32>
    %117 = arith.addf %104, %116 : vector<5x1xf32>
    %118 = vector.broadcast %116 : vector<5x1xf32> to vector<5x16xf32>
    %119 = arith.cmpf oeq, %114, %118 : vector<5x16xf32>
    %c16_i32_41 = arith.constant 16 : i32
    %120 = vector.broadcast %c16_i32_41 : i32 to vector<5x16xi32>
    %121 = arith.select %119, %29, %120 : vector<5x16xi1>, vector<5x16xi32>
    %cst_42 = arith.constant dense<2147483647> : vector<5xi32>
    %122 = vector.multi_reduction <minsi>, %121, %cst_42 [1] : vector<5x16xi32> to vector<5xi32>
    %123 = vector.shape_cast %122 : vector<5xi32> to vector<5x1xi32>
    %124 = vector.broadcast %123 : vector<5x1xi32> to vector<5x16xi32>
    %125 = arith.cmpi eq, %29, %124 : vector<5x16xi32>
    %cst_43 = arith.constant 0xFF800000 : f32
    %126 = vector.broadcast %cst_43 : f32 to vector<5x16xf32>
    %127 = arith.select %125, %126, %114 : vector<5x16xi1>, vector<5x16xf32>
    %cst_44 = arith.constant dense<0xFF800000> : vector<5xf32>
    %128 = vector.multi_reduction <maximumf>, %127, %cst_44 [1] : vector<5x16xf32> to vector<5xf32>
    %129 = vector.shape_cast %128 : vector<5xf32> to vector<5x1xf32>
    %130 = arith.addf %117, %129 : vector<5x1xf32>
    %131 = vector.broadcast %129 : vector<5x1xf32> to vector<5x16xf32>
    %132 = arith.cmpf oeq, %127, %131 : vector<5x16xf32>
    %c16_i32_45 = arith.constant 16 : i32
    %133 = vector.broadcast %c16_i32_45 : i32 to vector<5x16xi32>
    %134 = arith.select %132, %29, %133 : vector<5x16xi1>, vector<5x16xi32>
    %cst_46 = arith.constant dense<2147483647> : vector<5xi32>
    %135 = vector.multi_reduction <minsi>, %134, %cst_46 [1] : vector<5x16xi32> to vector<5xi32>
    %136 = vector.shape_cast %135 : vector<5xi32> to vector<5x1xi32>
    %137 = vector.broadcast %136 : vector<5x1xi32> to vector<5x16xi32>
    %138 = arith.cmpi eq, %29, %137 : vector<5x16xi32>
    %cst_47 = arith.constant 0xFF800000 : f32
    %139 = vector.broadcast %cst_47 : f32 to vector<5x16xf32>
    %140 = arith.select %138, %139, %127 : vector<5x16xi1>, vector<5x16xf32>
    %cst_48 = arith.constant dense<0xFF800000> : vector<5xf32>
    %141 = vector.multi_reduction <maximumf>, %140, %cst_48 [1] : vector<5x16xf32> to vector<5xf32>
    %142 = vector.shape_cast %141 : vector<5xf32> to vector<5x1xf32>
    %143 = arith.addf %130, %142 : vector<5x1xf32>
    %144 = tpu.concatenate %86, %143 in 1 : vector<5x1xf32>, vector<5x1xf32> -> vector<5x2xf32>
    %145 = tpu.iota {dimensions = array<i32: 0>} : vector<2x2xi32>
    %146 = tpu.iota {dimensions = array<i32: 1>} : vector<2x2xi32>
    %147 = arith.cmpi eq, %145, %146 : vector<2x2xi32>
    %148 = arith.extui %147 : vector<2x2xi1> to vector<2x2xi32>
    %149 = arith.sitofp %148 : vector<2x2xi32> to vector<2x2xf32>
    %cst_49 = arith.constant dense<0.000000e+00> : vector<2x5xf32>
    %150 = tpu.matmul %149, %144, %cst_49 {dimension_numbers = #tpu.dot_dimension_numbers<[1], [1], [0], [0], [0, 0, 1, 0], [], []>} : vector<2x2xf32>, vector<5x2xf32>, vector<2x5xf32> -> vector<2x5xf32>
    %c0_50 = arith.constant 0 : index
    %151 = memref.load %arg4[%c0_50] : memref<2xf32, #tpu.memory_space<smem>>
    %c1 = arith.constant 1 : index
    %152 = memref.load %arg4[%c1] : memref<2xf32, #tpu.memory_space<smem>>
    %153 = vector.broadcast %152 : f32 to vector<2x5xf32>
    %154 = arith.addf %150, %153 : vector<2x5xf32>
    %155 = vector.broadcast %151 : f32 to vector<2x5xf32>
    %156 = arith.mulf %155, %154 : vector<2x5xf32>
    %c0_51 = arith.constant 0 : index
    %c0_52 = arith.constant 0 : index
    %157 = vector.load %arg5[%c0_51, %c0_52] : memref<2x5xf32, #tpu.memory_space<vmem>>, vector<2x5xf32>
    tpu.vector_store %arg5[%c0_51, %c0_52], %156 {strides = array<i32>} : memref<2x5xf32, #tpu.memory_space<vmem>>, vector<2x5xf32>,
    return
  }
}

</mosaic_0001>

<bundles_post_ra>
// kernel: tpu_custom_call.1
= control target key start
LH: loop header
LB: loop body
LE: loop exit
PB: predicated region body
PF: predicated region fallthrough
CT: control target
= control target key end

     0   :  { %10 = vsyncpa [#allocation3], 0  ;;  %s1325_s0 = inlined_call_operand.hbm [shape: f32[112,128], index: 0, kind: input, shape index: {}]   ;;  %s1326_s1 = inlined_call_operand.hbm [shape: f32[128,128], index: 1, kind: input, shape index: {}]   ;;  %s1327_s2 = inlined_call_operand.vmem [shape: f32[1,128], index: 2, kind: input, shape index: {}]   ;;  %s1328_s3 = inlined_call_operand.hbm [shape: f32[80,80], index: 3, kind: input, shape index: {}]   ;;  %s1329_s4 = inlined_call_operand.vmem [shape: f32[2], index: 4, kind: input, shape index: {}]   ;;  %s1330_s5 = inlined_call_operand.hbm [shape: f32[2,5], index: 5, kind: output, shape index: {}]  }
   0x1   :  { %11 = vsyncpa [#allocation7], 0 }
   0x2   :  { %12 = vsyncpa [#allocation5], 0 }
   0x3   :  { %13 = vsyncpa [#allocation4], 0  ;;  %s31_s20 = sshll.u32 %s1326_s1, 4  ;;  %s1077_s21 = smov [#allocation6]   ;;  %s32_s20 = int_to_ptr.hbm [resolvable:$true] %s31_s20 }
   0x4   :  { %s33_s22 = sshll.u32 %s1077_s21, 4  ;;  %s18_s25 = sshll.u32 %s1325_s0, 4  ;;  %s34_s22 = int_to_ptr.vmem [resolvable:$true] %s33_s22  ;;  %s19_s25 = int_to_ptr.hbm [resolvable:$true] %s18_s25 }
   0x5   :  { %s1078_s26 = smov 128   ;;  %s1079_s27 = smov 8  }
   0x6   :  { %39 = dma.hbm_to_vmem [thread:$0]  %s32_s20, 2048, %s34_s22, [#allocation7], %s1078_s26, %s1078_s26, %s1079_s27  }
   0x7   :  { %s1080_s28 = smov [#allocation2]   ;;  %s46_s7 = sshll.u32 %s1328_s3, 4  ;;  %s47_s7 = int_to_ptr.hbm [resolvable:$true] %s46_s7 }
   0x8   :  { %s20_s29 = sshll.u32 %s1080_s28, 4  ;;  %s60_s9 = sshll.u32 %s1329_s4, 4  ;;  %s21_s29 = int_to_ptr.vmem [resolvable:$true] %s20_s29  ;;  %s61_s9 = int_to_ptr.vmem [resolvable:$true] %s60_s9 }
   0x9   :  { %26 = dma.hbm_to_vmem [thread:$0]  %s19_s25, 1792, %s21_s29, [#allocation3], %s1078_s26, %s1078_s26, %s1079_s27  }
   0xa   :  { %s1081_s10 = smov [#allocation8]   ;;  %s1082_s0 = smov [#allocation9]  }
   0xb   :  { %s48_s11 = sshll.u32 %s1081_s10, 4  ;;  %s49_s11 = int_to_ptr.vmem [resolvable:$true] %s48_s11 }
   0xc   :  { %54 = dma.hbm_to_vmem [thread:$0]  %s47_s7, 1280, %s49_s11, [#allocation7], %s1078_s26, %s1078_s26, %s1079_s27  }
   0xd   :  { %63 = dma.vmem_to_smem %s61_s9, 16, %s1082_s0, [#allocation5]  }
   0xe   :  { %1069 = dma.done.wait [#allocation3], 1792  }
   0xf   :  { %1070 = vsyncadd [#allocation3], 4294965504 }
  0x10   :  { %1071 = dma.done.wait [#allocation7], 3328  }
  0x11   :  { %1072 = vsyncadd [#allocation7], 4294963968 }
  0x12   :  { %1073 = dma.done.wait [#allocation5], 16  }
  0x13   :  { %1074 = vsyncadd [#allocation5], 4294967280 }
  0x14   :  { %80 = sfence }
  0x15   :  { %v110_v0 = vld [vmem:[#allocation6 + $0x78] sm:$0xff]  ;;  %v109_v1 = vld [vmem:[#allocation6 + $0x70] sm:$0xff]  ;;  %v108_v2 = vld [vmem:[#allocation6 + $0x68] sm:$0xff]  ;;  %vm184_vm0 = vcmask 654336   ;;  %s1084_s12 = smov 112   ;;  %s903_s13 = sld [smem:[#allocation9 + $0x1]] }
  0x16   :  { %115 = vmatpush.msra.mxu0 %v110_v0  ;;  %906 = vmatpush.msra.mxu3 %v110_v0  ;;  %v107_v3 = vld [vmem:[#allocation6 + $0x60] sm:$0xff]  ;;  %v106_v4 = vld [vmem:[#allocation6 + $0x58] sm:$0xff]  ;;  %v105_v5 = vld [vmem:[#allocation6 + $0x50] sm:$0xff]  ;;  %s839_s14 = sld [smem:[#allocation9]]  ;;  %s1086_s15 = smov [#allocation10]  }
  0x17   :  { %v104_v6 = vld [vmem:[#allocation6 + $0x48] sm:$0xff]  ;;  %v103_v7 = vld [vmem:[#allocation6 + $0x40] sm:$0xff]  ;;  %v102_v8 = vld [vmem:[#allocation6 + $0x38] sm:$0xff]  ;;  %s878_s16 = sshll.u32 %s1086_s15, 4  ;;  %s880_s19 = sshll.u32 %s1330_s5, 4  ;;  %s879_s16 = int_to_ptr.vmem [resolvable:$true] %s878_s16  ;;  %s881_s19 = int_to_ptr.hbm [resolvable:$true] %s880_s19 }
  0x18   :  { %116 = vmatpush.msra.mxu0 %v109_v1  ;;  %907 = vmatpush.msra.mxu3 %v109_v1  ;;  %v101_v9 = vld [vmem:[#allocation6 + $0x30] sm:$0xff]  ;;  %v100_v10 = vld [vmem:[#allocation6 + $0x28] sm:$0xff]  ;;  %v99_v11 = vld [vmem:[#allocation6 + $0x20] sm:$0xff] }
  0x19   :  { %v98_v12 = vld [vmem:[#allocation6 + $0x18] sm:$0xff]  ;;  %v97_v13 = vld [vmem:[#allocation6 + $0x10] sm:$0xff]  ;;  %v96_v14 = vld [vmem:[#allocation6 + $0x8] sm:$0xff] }
  0x1a   :  { %117 = vmatpush.msra.mxu0 %v108_v2  ;;  %908 = vmatpush.msra.mxu3 %v108_v2  ;;  %v95_v15 = vld [vmem:[#allocation6] sm:$0xff]  ;;  %v81_v16 = vld [vmem:[#allocation2] sm:$0xff]  ;;  %v82_v18 = vld [vmem:[#allocation2 + $0x8] sm:$0xff] }
  0x1b   :  { %v89_v17 = vld [vmem:[#allocation2 + $0x40] sm:$0xff]  ;;  %v90_v19 = vld [vmem:[#allocation2 + $0x48] sm:$0xff]  ;;  %v83_v20 = vld [vmem:[#allocation2 + $0x10] sm:$0xff] }
  0x1c   :  { %118 = vmatpush.msra.mxu0 %v107_v3  ;;  %909 = vmatpush.msra.mxu3 %v107_v3  ;;  %v91_v21 = vld [vmem:[#allocation2 + $0x50] sm:$0xff]  ;;  %v84_v22 = vld [vmem:[#allocation2 + $0x18] sm:$0xff]  ;;  %v85_v24 = vld [vmem:[#allocation2 + $0x20] sm:$0xff] }
  0x1d   :  { %v92_v23 = vld [vmem:[#allocation2 + $0x58] sm:$0xff]  ;;  %v93_v25 = vld [vmem:[#allocation2 + $0x60] sm:$0xff]  ;;  %v86_v26 = vld [vmem:[#allocation2 + $0x28] sm:$0xff] }
  0x1e   :  { %119 = vmatpush.msra.mxu0 %v106_v4  ;;  %910 = vmatpush.msra.mxu3 %v106_v4  ;;  %v94_v27 = vld [vmem:[#allocation2 + $0x68] sm:$0xff]  ;;  %v87_v28 = vld [vmem:[#allocation2 + $0x30] sm:$0xff]  ;;  %v88_v29 = vld [vmem:[#allocation2 + $0x38] sm:$0xff] }
  0x1f   :  { %v932_v33 = vld [vmem:[%s1327_s2] ss:$0 sm:$0xff]  ;;  %v174_v63 = vld [vmem:[#allocation8] sm:$0xff]  ;;  %v175_v0 = vld [vmem:[#allocation8 + $0x8] sm:$0xff]  ;;  %s1083_s2 = smov 16  }
  0x20   :  { %120 = vmatpush.msra.mxu0 %v105_v5  ;;  %911 = vmatpush.msra.mxu3 %v105_v5  ;;  %v176_v1 = vld [vmem:[#allocation8 + $0x10] sm:$0xff]  ;;  %v177_v2 = vld [vmem:[#allocation8 + $0x18] sm:$0xff]  ;;  %v178_v3 = vld [vmem:[#allocation8 + $0x20] sm:$0xff] }
  0x21   :  { %v179_v4 = vld [vmem:[#allocation8 + $0x28] sm:$0xff]  ;;  %v180_v5 = vld [vmem:[#allocation8 + $0x30] sm:$0xff] }
  0x22   :  { %121 = vmatpush.msra.mxu0 %v104_v6  ;;  %912 = vmatpush.msra.mxu3 %v104_v6  ;;  %v181_v6 = vld [vmem:[#allocation8 + $0x38] sm:$0xff] }
  0x24   :  { %122 = vmatpush.msra.mxu0 %v103_v7  ;;  %913 = vmatpush.msra.mxu3 %v103_v7  ;;  %v182_v7 = vld [vmem:[#allocation8 + $0x40] sm:$0xff] }
  0x26   :  { %123 = vmatpush.msra.mxu0 %v102_v8  ;;  %914 = vmatpush.msra.mxu3 %v102_v8  ;;  %v183_v8 = vld [vmem:[#allocation8 + $0x48] sm:$0xff] }
  0x28   :  { %124 = vmatpush.msra.mxu0 %v101_v9  ;;  %915 = vmatpush.msra.mxu3 %v101_v9 }
  0x2a   :  { %125 = vmatpush.msra.mxu0 %v100_v10  ;;  %916 = vmatpush.msra.mxu3 %v100_v10 }
  0x2c   :  { %126 = vmatpush.msra.mxu0 %v99_v11  ;;  %917 = vmatpush.msra.mxu3 %v99_v11 }
  0x2e   :  { %127 = vmatpush.msra.mxu0 %v98_v12  ;;  %918 = vmatpush.msra.mxu3 %v98_v12 }
  0x30   :  { %128 = vmatpush.msra.mxu0 %v97_v13  ;;  %919 = vmatpush.msra.mxu3 %v97_v13 }
  0x32   :  { %129 = vmatpush.msra.mxu0 %v96_v14  ;;  %920 = vmatpush.msra.mxu3 %v96_v14 }
  0x34   :  { %130 = vmatpush.msra.mxu0 %v95_v15  ;;  %921 = vmatpush.msra.mxu3 %v95_v15 }
  0x35   :  { %131 = vmatmul.f32.vlgmr.msra.gmra.mxu0 %v81_v16  ;;  %155 = vmatmul.f32.vlgmr.msra.gmra.mxu3 %v89_v17 }
  0x3d   :  { %134 = vmatmul.f32.gmra.mxu0 %v82_v18  ;;  %158 = vmatmul.f32.gmra.mxu3 %v90_v19 }
  0x45   :  { %137 = vmatmul.f32.gmra.mxu0 %v83_v20  ;;  %161 = vmatmul.f32.gmra.mxu3 %v91_v21 }
  0x4d   :  { %140 = vmatmul.f32.gmra.mxu0 %v84_v22  ;;  %164 = vmatmul.f32.gmra.mxu3 %v92_v23 }
  0x55   :  { %143 = vmatmul.f32.gmra.mxu0 %v85_v24  ;;  %167 = vmatmul.f32.gmra.mxu3 %v93_v25 }
  0x5d   :  { %146 = vmatmul.f32.gmra.mxu0 %v86_v26  ;;  %170 = vmatmul.f32.gmra.mxu3 %v94_v27 }
  0x65   :  { %149 = vmatmul.f32.gmra.mxu0 %v87_v28 }
  0x6d   :  { %152 = vmatmul.f32.gmra.mxu0 %v88_v29 }
  0xb2   :  { %v132_v30 = vpop.f32.mrf.mxu0 }
  0xb3   :  { %v133_v62 = vadd.f32 %v932_v33, %v132_v30 }
  0xb8   :  { %v156_v31 = vpop.f32.mrf.mxu3 }
  0xb9   :  { %v157_v35 = vadd.f32 %v932_v33, %v156_v31 }
  0xba   :  { %v135_v32 = vpop.f32.mrf.mxu0 }
  0xbb   :  { %v136_v61 = vadd.f32 %v932_v33, %v135_v32 }
  0xc0   :  { %v159_v34 = vpop.f32.mrf.mxu3 }
  0xc1   :  { %v160_v36 = vadd.f32 %v932_v33, %v159_v34 }
  0xc2   :  { %v138_v37 = vpop.f32.mrf.mxu0 }
  0xc3   :  { %221 = vmatpush.msra.mxu1 %v160_v36  ;;  %v139_v60 = vadd.f32 %v932_v33, %v138_v37 }
  0xc5   :  { %222 = vmatpush.msra.mxu1 %v157_v35 }
  0xc8   :  { %v162_v38 = vpop.f32.mrf.mxu3 }
  0xc9   :  { %v1136_v44 = vadd.f32 %v932_v33, %v162_v38 }
  0xca   :  { %v141_v39 = vpop.f32.mrf.mxu0 }
  0xcb   :  { %v412_v46 = vmul.f32 %v1136_v44, %v1136_v44  ;;  %v142_v59 = vadd.f32 %v932_v33, %v141_v39 }
  0xd0   :  { %v165_v40 = vpop.f32.mrf.mxu3 }
  0xd1   :  { %v1132_v41 = vadd.f32 %v932_v33, %v165_v40 }
  0xd2   :  { %v144_v42 = vpop.f32.mrf.mxu0 }
  0xd3   :  { %v413_v43 = vmul.f32 %v1132_v41, %v1132_v41  ;;  %v145_v58 = vadd.f32 %v932_v33, %v144_v42 }
  0xd5   :  { %418 = vadd.xlane.f32.xlu1 %v413_v43 }
  0xd8   :  { %v168_v45 = vpop.f32.mrf.mxu3 }
  0xd9   :  { %v1144_v52 = vadd.f32 %v932_v33, %v168_v45 }
  0xda   :  { %v147_v47 = vpop.f32.mrf.mxu0 }
  0xdb   :  { %v414_v53 = vmul.f32 %v1144_v52, %v1144_v52  ;;  %v148_v57 = vadd.f32 %v932_v33, %v147_v47 }
  0xdd   :  { %416 = vadd.xlane.f32.xlu1 %v412_v46 }
  0xe0   :  { %v171_v48 = vpop.f32.mrf.mxu3 }
  0xe1   :  { %v1140_v49 = vadd.f32 %v932_v33, %v171_v48 }
  0xe2   :  { %v150_v50 = vpop.f32.mrf.mxu0 }
  0xe3   :  { %v415_v51 = vmul.f32 %v1140_v49, %v1140_v49  ;;  %v151_v56 = vadd.f32 %v932_v33, %v150_v50 }
  0xe5   :  { %422 = vadd.xlane.f32.xlu0 %v415_v51 }
  0xea   :  { %v153_v54 = vpop.f32.mrf.mxu0 }
  0xeb   :  { %v154_v55 = vadd.f32 %v932_v33, %v153_v54 }
  0xed   :  { %420 = vadd.xlane.f32.xlu0 %v414_v53  ;;  %223 = vmatpush.msra.mxu1 %v154_v55 }
  0xef   :  { %224 = vmatpush.msra.mxu1 %v151_v56 }
  0xf1   :  { %225 = vmatpush.msra.mxu1 %v148_v57 }
  0xf3   :  { %226 = vmatpush.msra.mxu1 %v145_v58 }
  0xf5   :  { %227 = vmatpush.msra.mxu1 %v142_v59 }
  0xf7   :  { %228 = vmatpush.msra.mxu1 %v139_v60 }
  0xf9   :  { %229 = vmatpush.msra.mxu1 %v136_v61 }
  0xfb   :  { %230 = vmatpush.msra.mxu1 %v133_v62 }
  0xfc   :  { %892 = vmatmul.msk.f32.vlgmr.msra.gmra.mxu1 %vm184_vm0, %v174_v63 }
 0x104   :  { %893 = vmatmul.msk.f32.gmra.mxu1 %vm184_vm0, %v175_v0 }
 0x10c   :  { %894 = vmatmul.msk.f32.gmra.mxu1 %vm184_vm0, %v176_v1 }
 0x114   :  { %895 = vmatmul.msk.f32.gmra.mxu1 %vm184_vm0, %v177_v2 }
 0x11c   :  { %896 = vmatmul.msk.f32.gmra.mxu1 %vm184_vm0, %v178_v3 }
 0x124   :  { %897 = vmatmul.msk.f32.gmra.mxu1 %vm184_vm0, %v179_v4 }
 0x12c   :  { %898 = vmatmul.msk.f32.gmra.mxu1 %vm184_vm0, %v180_v5 }
 0x134   :  { %899 = vmatmul.msk.f32.gmra.mxu1 %vm184_vm0, %v181_v6 }
 0x13c   :  { %900 = vmatmul.msk.f32.gmra.mxu1 %vm184_vm0, %v182_v7 }
 0x144   :  { %901 = vmatmul.msk.f32.gmra.mxu1 %vm184_vm0, %v183_v8 }
 0x148   :  { %v419_v9 = vpop.xlane.xlu1 %418 }
 0x149   :  { %v425_v10 = vmax.f32 %v419_v9, 1e-24 }
 0x14b   :  { %933 = vrsqrt.f32 %v425_v10  ;;  %vm444_vm6 = vweird.f32 %v425_v10 }
 0x150   :  { %v417_v11 = vpop.xlane.xlu1 %416 }
 0x151   :  { %v424_v13 = vmax.f32 %v417_v11, 1e-24  ;;  %v934_v15 = vpop.eup %933 }
 0x152   :  { %v439_v18 = vmul.f32 %v934_v15, %v425_v10  ;;  %vm445_vm7 = vweird.f32 %v934_v15 }
 0x153   :  { %vm446_vm9 = vmor %vm444_vm6, %vm445_vm7  ;;  %vm434_vm10 = vweird.f32 %v424_v13 }
 0x154   :  { %v440_v23 = vmul.f32 %v934_v15, %v439_v18 }
 0x156   :  { %v441_v28 = vmul.f32 0.5, %v440_v23 }
 0x158   :  { %v423_v12 = vpop.xlane.xlu0 %422  ;;  %v442_v34 = vsub.f32 1.5, %v441_v28 }
 0x159   :  { %v427_v14 = vmax.f32 %v423_v12, 1e-24 }
 0x15a   :  { %v443_v42 = vmul.f32 %v934_v15, %v442_v34 }
 0x15b   :  { %935 = vrsqrt.f32 %v427_v14  ;;  %vm464_vm1 = vweird.f32 %v427_v14 }
 0x15c   :  { %937 = vrsqrt.f32 %v424_v13  ;;  %v447_v46 = vsel %vm446_vm9, %v934_v15, %v443_v42 }
 0x160   :  { %v421_v16 = vpop.xlane.xlu0 %420 }
 0x161   :  { %v936_v17 = vpop.eup %935  ;;  %v426_v19 = vmax.f32 %v421_v16, 1e-24 }
 0x162   :  { %v459_v20 = vmul.f32 %v936_v17, %v427_v14  ;;  %v938_v21 = vpop.eup %937  ;;  %vm465_vm2 = vweird.f32 %v936_v17 }
 0x163   :  { %939 = vrsqrt.f32 %v426_v19  ;;  %v429_v24 = vmul.f32 %v938_v21, %v424_v13  ;;  %vm466_vm3 = vmor %vm464_vm1, %vm465_vm2  ;;  %vm454_vm4 = vweird.f32 %v426_v19  ;;  %vm435_vm11 = vweird.f32 %v938_v21 }
 0x164   :  { %v460_v22 = vmul.f32 %v936_v17, %v459_v20  ;;  %vm436_vm12 = vmor %vm434_vm10, %vm435_vm11 }
 0x165   :  { %v430_v29 = vmul.f32 %v938_v21, %v429_v24 }
 0x166   :  { %v461_v25 = vmul.f32 0.5, %v460_v22 }
 0x167   :  { %v431_v36 = vmul.f32 0.5, %v430_v29 }
 0x168   :  { %v462_v26 = vsub.f32 1.5, %v461_v25 }
 0x169   :  { %v940_v27 = vpop.eup %939  ;;  %v432_v39 = vsub.f32 1.5, %v431_v36 }
 0x16a   :  { %v449_v30 = vmul.f32 %v940_v27, %v426_v19  ;;  %v463_v31 = vmul.f32 %v936_v17, %v462_v26  ;;  %vm455_vm5 = vweird.f32 %v940_v27 }
 0x16b   :  { %vm456_vm8 = vmor %vm454_vm4, %vm455_vm5  ;;  %v433_v47 = vmul.f32 %v938_v21, %v432_v39 }
 0x16c   :  { %v450_v32 = vmul.f32 %v940_v27, %v449_v30  ;;  %v467_v33 = vsel %vm466_vm3, %v936_v17, %v463_v31 }
 0x16d   :  { %v471_v35 = vmul.f32 %v467_v33, %v1140_v49  ;;  %v469_v49 = vmul.f32 %v447_v46, %v1132_v41  ;;  %v437_v51 = vsel %vm436_vm12, %v938_v21, %v433_v47 }
 0x16e   :  { %v451_v37 = vmul.f32 0.5, %v450_v32  ;;  %v468_v53 = vmul.f32 %v437_v51, %v1136_v44 }
 0x16f   :  { %484 = vmatpush.xpose.msra.mxu2 %v471_v35 }
 0x170   :  { %v452_v38 = vsub.f32 1.5, %v451_v37 }
 0x172   :  { %v453_v40 = vmul.f32 %v940_v27, %v452_v38 }
 0x174   :  { %v457_v43 = vsel %vm456_vm8, %v940_v27, %v453_v40 }
 0x175   :  { %v470_v45 = vmul.f32 %v457_v43, %v1144_v52 }
 0x177   :  { %485 = vmatpush.xpose.msra.mxu2 %v470_v45 }
 0x179   :  { %v232_v48 = vpop.f32.mrf.mxu1 }
 0x17a   :  { %v262_v50 = vmul.f32 %v232_v48, %v232_v48 }
 0x17b   :  { %486 = vmatpush.xpose.msra.mxu2 %v469_v49 }
 0x17c   :  { %272 = vadd.xlane.f32.xlu2 %v262_v50 }
 0x17f   :  { %487 = vmatpush.xpose.msra.mxu2 %v468_v53 }
 0x181   :  { %v1162_v54 = vpop.f32.mrf.mxu1 }
 0x182   :  { %v263_v55 = vmul.f32 %v1162_v54, %v1162_v54 }
 0x184   :  { %274 = vadd.xlane.f32.xlu2 %v263_v55 }
 0x189   :  { %v1166_v52 = vpop.f32.mrf.mxu1 }
 0x18a   :  { %v264_v56 = vmul.f32 %v1166_v52, %v1166_v52 }
 0x18c   :  { %276 = vadd.xlane.f32.xlu0 %v264_v56 }
 0x191   :  { %v1170_v41 = vpop.f32.mrf.mxu1 }
 0x192   :  { %v265_v57 = vmul.f32 %v1170_v41, %v1170_v41 }
 0x194   :  { %278 = vadd.xlane.f32.xlu1 %v265_v57 }
 0x199   :  { %v1174_v44 = vpop.f32.mrf.mxu1 }
 0x19a   :  { %v266_v58 = vmul.f32 %v1174_v44, %v1174_v44 }
 0x19c   :  { %280 = vadd.xlane.f32.xlu2 %v266_v58 }
 0x1a1   :  { %v1178_v59 = vpop.f32.mrf.mxu1 }
 0x1a2   :  { %v267_v60 = vmul.f32 %v1178_v59, %v1178_v59 }
 0x1a4   :  { %282 = vadd.xlane.f32.xlu0 %v267_v60 }
 0x1a9   :  { %v1182_v61 = vpop.f32.mrf.mxu1 }
 0x1aa   :  { %v268_v62 = vmul.f32 %v1182_v61, %v1182_v61 }
 0x1ac   :  { %284 = vadd.xlane.f32.xlu1 %v268_v62 }
 0x1b1   :  { %v1186_v63 = vpop.f32.mrf.mxu1 }
 0x1b2   :  { %v269_v0 = vmul.f32 %v1186_v63, %v1186_v63 }
 0x1b4   :  { %286 = vadd.xlane.f32.xlu2 %v269_v0 }
 0x1b9   :  { %v1190_v1 = vpop.f32.mrf.mxu1 }
 0x1ba   :  { %v270_v2 = vmul.f32 %v1190_v1, %v1190_v1 }
 0x1bc   :  { %288 = vadd.xlane.f32.xlu0 %v270_v2 }
 0x1c1   :  { %v1194_v3 = vpop.f32.mrf.mxu1 }
 0x1c2   :  { %v271_v4 = vmul.f32 %v1194_v3, %v1194_v3 }
 0x1c4   :  { %290 = vadd.xlane.f32.xlu1 %v271_v4 }
 0x1ef   :  { %v273_v5 = vpop.xlane.xlu2 %272 }
 0x1f0   :  { %v292_v6 = vmax.f32 %v273_v5, 1e-24 }
 0x1f2   :  { %941 = vrsqrt.f32 %v292_v6  ;;  %vm308_vm14 = vweird.f32 %v292_v6 }
 0x1f7   :  { %v275_v7 = vpop.xlane.xlu2 %274 }
 0x1f8   :  { %v942_v8 = vpop.eup %941  ;;  %v293_v9 = vmax.f32 %v275_v7, 1e-24 }
 0x1f9   :  { %v303_v10 = vmul.f32 %v942_v8, %v292_v6  ;;  %vm309_vm13 = vweird.f32 %v942_v8 }
 0x1fa   :  { %943 = vrsqrt.f32 %v293_v9  ;;  %vm310_vm15 = vmor %vm308_vm14, %vm309_vm13  ;;  %vm318_vm1 = vweird.f32 %v293_v9 }
 0x1fb   :  { %v304_v11 = vmul.f32 %v942_v8, %v303_v10 }
 0x1fd   :  { %v305_v12 = vmul.f32 0.5, %v304_v11 }
 0x1ff   :  { %v306_v13 = vsub.f32 1.5, %v305_v12  ;;  %v277_v14 = vpop.xlane.xlu0 %276 }
 0x200   :  { %v944_v15 = vpop.eup %943  ;;  %v294_v16 = vmax.f32 %v277_v14, 1e-24 }
 0x201   :  { %v313_v17 = vmul.f32 %v944_v15, %v293_v9  ;;  %v307_v18 = vmul.f32 %v942_v8, %v306_v13  ;;  %vm319_vm0 = vweird.f32 %v944_v15 }
 0x202   :  { %945 = vrsqrt.f32 %v294_v16  ;;  %vm320_vm2 = vmor %vm318_vm1, %vm319_vm0  ;;  %vm328_vm4 = vweird.f32 %v294_v16 }
 0x203   :  { %v314_v19 = vmul.f32 %v944_v15, %v313_v17  ;;  %v311_v20 = vsel %vm310_vm15, %v942_v8, %v307_v18 }
 0x204   :  { %v402_v21 = vmul.f32 %v311_v20, %v232_v48 }
 0x205   :  { %v315_v22 = vmul.f32 0.5, %v314_v19 }
 0x206   :  { %488 = vmatmul.f32.vlgmr.msra.gmra.mxu2 %v402_v21 }
 0x207   :  { %v316_v23 = vsub.f32 1.5, %v315_v22  ;;  %v279_v24 = vpop.xlane.xlu1 %278 }
 0x208   :  { %v946_v25 = vpop.eup %945  ;;  %v295_v26 = vmax.f32 %v279_v24, 1e-24 }
 0x209   :  { %v323_v27 = vmul.f32 %v946_v25, %v294_v16  ;;  %v317_v28 = vmul.f32 %v944_v15, %v316_v23  ;;  %vm329_vm3 = vweird.f32 %v946_v25 }
 0x20a   :  { %947 = vrsqrt.f32 %v295_v26  ;;  %vm330_vm5 = vmor %vm328_vm4, %vm329_vm3  ;;  %vm338_vm7 = vweird.f32 %v295_v26 }
 0x20b   :  { %v324_v29 = vmul.f32 %v946_v25, %v323_v27  ;;  %v321_v30 = vsel %vm320_vm2, %v944_v15, %v317_v28 }
 0x20c   :  { %v403_v31 = vmul.f32 %v321_v30, %v1162_v54 }
 0x20d   :  { %v325_v32 = vmul.f32 0.5, %v324_v29 }
 0x20e   :  { %491 = vmatmul.f32.gmra.mxu2 %v403_v31 }
 0x20f   :  { %v326_v33 = vsub.f32 1.5, %v325_v32  ;;  %v281_v34 = vpop.xlane.xlu2 %280 }
 0x210   :  { %v948_v35 = vpop.eup %947  ;;  %v296_v36 = vmax.f32 %v281_v34, 1e-24 }
 0x211   :  { %v333_v37 = vmul.f32 %v948_v35, %v295_v26  ;;  %v327_v38 = vmul.f32 %v946_v25, %v326_v33  ;;  %vm339_vm6 = vweird.f32 %v948_v35 }
 0x212   :  { %949 = vrsqrt.f32 %v296_v36  ;;  %vm340_vm8 = vmor %vm338_vm7, %vm339_vm6  ;;  %vm348_vm10 = vweird.f32 %v296_v36 }
 0x213   :  { %v334_v39 = vmul.f32 %v948_v35, %v333_v37  ;;  %v331_v40 = vsel %vm330_vm5, %v946_v25, %v327_v38 }
 0x214   :  { %v404_v42 = vmul.f32 %v331_v40, %v1166_v52 }
 0x215   :  { %v335_v43 = vmul.f32 0.5, %v334_v39 }
 0x216   :  { %494 = vmatmul.f32.gmra.mxu2 %v404_v42 }
 0x217   :  { %v336_v45 = vsub.f32 1.5, %v335_v43  ;;  %v283_v46 = vpop.xlane.xlu0 %282 }
 0x218   :  { %v950_v47 = vpop.eup %949  ;;  %v297_v48 = vmax.f32 %v283_v46, 1e-24 }
 0x219   :  { %v343_v49 = vmul.f32 %v950_v47, %v296_v36  ;;  %v337_v50 = vmul.f32 %v948_v35, %v336_v45  ;;  %vm349_vm9 = vweird.f32 %v950_v47 }
 0x21a   :  { %951 = vrsqrt.f32 %v297_v48  ;;  %vm350_vm11 = vmor %vm348_vm10, %vm349_vm9  ;;  %vm358_vm13 = vweird.f32 %v297_v48 }
 0x21b   :  { %v344_v51 = vmul.f32 %v950_v47, %v343_v49  ;;  %v341_v53 = vsel %vm340_vm8, %v948_v35, %v337_v50 }
 0x21c   :  { %v405_v54 = vmul.f32 %v341_v53, %v1170_v41 }
 0x21d   :  { %v345_v55 = vmul.f32 0.5, %v344_v51 }
 0x21e   :  { %497 = vmatmul.f32.gmra.mxu2 %v405_v54 }
 0x21f   :  { %v346_v56 = vsub.f32 1.5, %v345_v55  ;;  %v285_v52 = vpop.xlane.xlu1 %284 }
 0x220   :  { %v952_v57 = vpop.eup %951  ;;  %v298_v58 = vmax.f32 %v285_v52, 1e-24  ;;  %v565_v52 = vlaneseq }
 0x221   :  { %v353_v60 = vmul.f32 %v952_v57, %v297_v48  ;;  %v347_v62 = vmul.f32 %v950_v47, %v346_v56  ;;  %vm359_vm12 = vweird.f32 %v952_v57 }
 0x222   :  { %953 = vrsqrt.f32 %v298_v58  ;;  %vm360_vm14 = vmor %vm358_vm13, %vm359_vm12  ;;  %vm368_vm0 = vweird.f32 %v298_v58  ;;  %vm572_vm12 = vcmask 1041409   ;;  %vm574_vm13 = vcmask 1042434  }
 0x223   :  { %v354_v0 = vmul.f32 %v952_v57, %v353_v60  ;;  %v351_v2 = vsel %vm350_vm11, %v950_v47, %v347_v62  ;;  %vm519_vm11 = vcmask 261120  }
 0x224   :  { %v406_v4 = vmul.f32 %v351_v2, %v1174_v44  ;;  %v1216_v2 = vand.u32 127, %v565_v52 }
 0x225   :  { %v355_v5 = vmul.f32 0.5, %v354_v0 }
 0x226   :  { %500 = vmatmul.f32.gmra.mxu2 %v406_v4  ;;  %724 = vrot.lane.b32.xlu1 %v1216_v2, %s1083_s2 }
 0x227   :  { %v356_v6 = vsub.f32 1.5, %v355_v5  ;;  %v287_v41 = vpop.xlane.xlu2 %286 }
 0x228   :  { %v954_v7 = vpop.eup %953  ;;  %v299_v8 = vmax.f32 %v287_v41, 1e-24 }
 0x229   :  { %v363_v9 = vmul.f32 %v954_v7, %v298_v58  ;;  %v357_v10 = vmul.f32 %v952_v57, %v356_v6  ;;  %vm369_vm15 = vweird.f32 %v954_v7 }
 0x22a   :  { %955 = vrsqrt.f32 %v299_v8  ;;  %vm370_vm1 = vmor %vm368_vm0, %vm369_vm15  ;;  %vm378_vm3 = vweird.f32 %v299_v8  ;;  %vm578_vm15 = vcmask 1044484   ;;  %vm704_vm0 = vcmask 258176  }
 0x22b   :  { %v364_v11 = vmul.f32 %v954_v7, %v363_v9  ;;  %v361_v12 = vsel %vm360_vm14, %v952_v57, %v357_v10  ;;  %vm576_vm14 = vcmask 1043459  }
 0x22c   :  { %v407_v13 = vmul.f32 %v361_v12, %v1178_v59 }
 0x22d   :  { %v365_v14 = vmul.f32 0.5, %v364_v11 }
 0x22e   :  { %503 = vmatmul.f32.gmra.mxu2 %v407_v13 }
 0x22f   :  { %v366_v15 = vsub.f32 1.5, %v365_v14  ;;  %v289_v44 = vpop.xlane.xlu0 %288 }
 0x230   :  { %v956_v16 = vpop.eup %955  ;;  %v300_v17 = vmax.f32 %v289_v44, 1e-24 }
 0x231   :  { %v373_v18 = vmul.f32 %v956_v16, %v299_v8  ;;  %v367_v19 = vmul.f32 %v954_v7, %v366_v15  ;;  %vm379_vm2 = vweird.f32 %v956_v16 }
 0x232   :  { %957 = vrsqrt.f32 %v300_v17  ;;  %vm380_vm4 = vmor %vm378_vm3, %vm379_vm2  ;;  %vm388_vm6 = vweird.f32 %v300_v17 }
 0x233   :  { %v374_v20 = vmul.f32 %v956_v16, %v373_v18  ;;  %v371_v21 = vsel %vm370_vm1, %v954_v7, %v367_v19  ;;  %vm581_vm1 = vcmask 126976  }
 0x234   :  { %v408_v22 = vmul.f32 %v371_v21, %v1182_v61 }
 0x235   :  { %v375_v23 = vmul.f32 0.5, %v374_v20 }
 0x236   :  { %506 = vmatmul.f32.gmra.mxu2 %v408_v22 }
 0x237   :  { %v376_v24 = vsub.f32 1.5, %v375_v23  ;;  %v291_v59 = vpop.xlane.xlu1 %290 }
 0x238   :  { %v958_v25 = vpop.eup %957  ;;  %v301_v26 = vmax.f32 %v291_v59, 1e-24 }
 0x239   :  { %v383_v27 = vmul.f32 %v958_v25, %v300_v17  ;;  %v377_v28 = vmul.f32 %v956_v16, %v376_v24  ;;  %vm389_vm5 = vweird.f32 %v958_v25 }
 0x23a   :  { %959 = vrsqrt.f32 %v301_v26  ;;  %vm390_vm7 = vmor %vm388_vm6, %vm389_vm5  ;;  %vm398_vm9 = vweird.f32 %v301_v26 }
 0x23b   :  { %v384_v29 = vmul.f32 %v958_v25, %v383_v27  ;;  %v381_v30 = vsel %vm380_vm4, %v956_v16, %v377_v28 }
 0x23c   :  { %v409_v31 = vmul.f32 %v381_v30, %v1186_v63 }
 0x23d   :  { %v385_v32 = vmul.f32 0.5, %v384_v29 }
 0x23e   :  { %509 = vmatmul.f32.gmra.mxu2 %v409_v31 }
 0x23f   :  { %v386_v33 = vsub.f32 1.5, %v385_v32 }
 0x240   :  { %v960_v61 = vpop.eup %959 }
 0x241   :  { %v393_v34 = vmul.f32 %v960_v61, %v301_v26  ;;  %v387_v35 = vmul.f32 %v958_v25, %v386_v33  ;;  %vm399_vm8 = vweird.f32 %v960_v61 }
 0x242   :  { %vm400_vm10 = vmor %vm398_vm9, %vm399_vm8 }
 0x243   :  { %v394_v36 = vmul.f32 %v960_v61, %v393_v34  ;;  %v391_v37 = vsel %vm390_vm7, %v958_v25, %v387_v35 }
 0x244   :  { %v410_v38 = vmul.f32 %v391_v37, %v1190_v1 }
 0x245   :  { %v395_v39 = vmul.f32 0.5, %v394_v36 }
 0x246   :  { %512 = vmatmul.f32.gmra.mxu2 %v410_v38 }
 0x247   :  { %v396_v40 = vsub.f32 1.5, %v395_v39 }
 0x249   :  { %v397_v42 = vmul.f32 %v960_v61, %v396_v40 }
 0x24b   :  { %v401_v63 = vsel %vm400_vm10, %v960_v61, %v397_v42 }
 0x24c   :  { %v411_v43 = vmul.f32 %v401_v63, %v1194_v3 }
 0x24e   :  { %515 = vmatmul.f32.gmra.mxu2 %v411_v43 }
 0x289   :  { %v489_v45 = vpop.f32.mrf.mxu2 }
 0x28a   :  { %v520_v60 = vsel %vm519_vm11, %v489_v45, -inf }
 0x291   :  { %v492_v46 = vpop.f32.mrf.mxu2 }
 0x292   :  { %v521_v54 = vsel %vm519_vm11, %v492_v46, -inf }
 0x293   :  { %v522_v4 = vmax.f32 %v520_v60, %v521_v54 }
 0x295   :  { %v523_v7 = vrot.slane %v522_v4, 4 }
 0x297   :  { %v524_v12 = vmax.f32 %v522_v4, %v523_v7 }
 0x299   :  { %v495_v47 = vpop.f32.mrf.mxu2  ;;  %v525_v44 = vrot.slane %v524_v12, 2 }
 0x29a   :  { %v529_v55 = vsel %vm519_vm11, %v495_v47, -inf }
 0x29b   :  { %v526_v23 = vmax.f32 %v524_v12, %v525_v44 }
 0x29d   :  { %v527_v28 = vrot.slane %v526_v23, 1 }
 0x29f   :  { %v528_v61 = vmax.f32 %v526_v23, %v527_v28 }
 0x2a1   :  { %v498_v48 = vpop.f32.mrf.mxu2 }
 0x2a2   :  { %v530_v1 = vsel %vm519_vm11, %v498_v48, -inf }
 0x2a3   :  { %v531_v3 = vmax.f32 %v529_v55, %v530_v1 }
 0x2a5   :  { %v532_v6 = vrot.slane %v531_v3, 4 }
 0x2a7   :  { %v533_v10 = vmax.f32 %v531_v3, %v532_v6 }
 0x2a9   :  { %v501_v49 = vpop.f32.mrf.mxu2  ;;  %v534_v14 = vrot.slane %v533_v10, 2 }
 0x2aa   :  { %v538_v57 = vsel %vm519_vm11, %v501_v49, -inf }
 0x2ab   :  { %v535_v18 = vmax.f32 %v533_v10, %v534_v14 }
 0x2ad   :  { %v536_v25 = vrot.slane %v535_v18, 1 }
 0x2af   :  { %v537_v31 = vmax.f32 %v535_v18, %v536_v25 }
 0x2b1   :  { %v504_v50 = vpop.f32.mrf.mxu2  ;;  %v573_v36 = vsel %vm572_vm12, %v537_v31, %v528_v61 }
 0x2b2   :  { %v539_v53 = vsel %vm519_vm11, %v504_v50, -inf }
 0x2b3   :  { %v540_v62 = vmax.f32 %v538_v57, %v539_v53  ;;  %v725_v53 = vpop.permute.xlu1 %724 }
 0x2b5   :  { %v541_v41 = vrot.slane %v540_v62, 4 }
 0x2b7   :  { %v542_v11 = vmax.f32 %v540_v62, %v541_v41 }
 0x2b9   :  { %v507_v51 = vpop.f32.mrf.mxu2  ;;  %v543_v15 = vrot.slane %v542_v11, 2 }
 0x2ba   :  { %v547_v0 = vsel %vm519_vm11, %v507_v51, -inf }
 0x2bb   :  { %v544_v21 = vmax.f32 %v542_v11, %v543_v15 }
 0x2bd   :  { %v545_v26 = vrot.slane %v544_v21, 1 }
 0x2bf   :  { %v546_v32 = vmax.f32 %v544_v21, %v545_v26 }
 0x2c1   :  { %v510_v56 = vpop.f32.mrf.mxu2  ;;  %v575_v38 = vsel %vm574_vm13, %v546_v32, %v573_v36 }
 0x2c2   :  { %v548_v58 = vsel %vm519_vm11, %v510_v56, -inf }
 0x2c3   :  { %v549_v5 = vmax.f32 %v547_v0, %v548_v58 }
 0x2c5   :  { %v550_v8 = vrot.slane %v549_v5, 4 }
 0x2c7   :  { %v551_v13 = vmax.f32 %v549_v5, %v550_v8 }
 0x2c9   :  { %v513_v9 = vpop.f32.mrf.mxu2  ;;  %v552_v16 = vrot.slane %v551_v13, 2 }
 0x2ca   :  { %v556_v19 = vsel %vm519_vm11, %v513_v9, -inf }
 0x2cb   :  { %v553_v24 = vmax.f32 %v551_v13, %v552_v16 }
 0x2cd   :  { %v554_v29 = vrot.slane %v553_v24, 1 }
 0x2cf   :  { %v555_v34 = vmax.f32 %v553_v24, %v554_v29 }
 0x2d1   :  { %v516_v17 = vpop.f32.mrf.mxu2  ;;  %v577_v39 = vsel %vm576_vm14, %v555_v34, %v575_v38 }
 0x2d2   :  { %v557_v20 = vsel %vm519_vm11, %v516_v17, -inf }
 0x2d3   :  { %v558_v22 = vmax.f32 %v556_v19, %v557_v20 }
 0x2d5   :  { %v559_v59 = vrot.slane %v558_v22, 4 }
 0x2d7   :  { %v560_v27 = vmax.f32 %v558_v22, %v559_v59 }
 0x2d9   :  { %v561_v30 = vrot.slane %v560_v27, 2 }
 0x2db   :  { %v562_v33 = vmax.f32 %v560_v27, %v561_v30 }
 0x2dd   :  { %v563_v35 = vrot.slane %v562_v33, 1 }
 0x2df   :  { %v564_v37 = vmax.f32 %v562_v33, %v563_v35 }
 0x2e1   :  { %v1225_v40 = vsel %vm578_vm15, %v564_v37, %v577_v39 }
 0x2e2   :  { %v705_v42 = vsel %vm704_vm0, %v1225_v40, -inf  ;;  %v582_v63 = vsel %vm581_vm1, %v1225_v40, -inf }
 0x2e3   :  { %706 = vmax.xlane.f32.xlu0 %v705_v42  ;;  %583 = vmax.xlane.f32.xlu2 %v582_v63 }
 0x356   :  { %v1231_v43 = vpop.xlane.xlu0 %706  ;;  %v1233_v45 = vpop.xlane.xlu2 %583 }
 0x357   :  { %v587_v46 = vrot.slane %v1233_v45, 1  ;;  %v588_v47 = vrot.slane %v1233_v45, 2  ;;  %v589_v48 = vrot.slane %v1233_v45, 3  ;;  %vm596_vm2 = vcmp.eq.f32.partialorder %v528_v61, %v1233_v45 }
 0x358   :  { %v601_v49 = vsel %vm596_vm2, %v1216_v2, 16  ;;  %v710_v50 = vrot.slane %v1231_v43, 1  ;;  %v711_v51 = vrot.slane %v1231_v43, 2  ;;  %v712_v1 = vrot.slane %v1231_v43, 3 }
 0x359   :  { %vm597_vm3 = vcmp.eq.f32.partialorder %v537_v31, %v587_v46  ;;  %vm1243_vm4 = vcmp.eq.f32.partialorder %v546_v32, %v588_v47  ;;  %v713_v55 = vrot.slane %v1231_v43, 4  ;;  %vm719_vm5 = vcmp.eq.f32.partialorder %v528_v61, %v1231_v43 }
 0x35a   :  { %v602_v56 = vsel %vm597_vm3, %v1216_v2, 16  ;;  %vm720_vm6 = vcmp.eq.f32.partialorder %v537_v31, %v710_v50  ;;  %vm721_vm7 = vcmp.eq.f32.partialorder %v546_v32, %v711_v51  ;;  %vm722_vm8 = vcmp.eq.f32.partialorder %v555_v34, %v712_v1 }
 0x35b   :  { %v606_v3 = vrot.slane %v602_v56, 7  ;;  %vm1250_vm9 = vcmp.eq.f32.partialorder %v564_v37, %v713_v55  ;;  %v726_v58 = vsel %vm719_vm5, %v725_v53, 16  ;;  %v727_v60 = vsel %vm720_vm6, %v725_v53, 16 }
 0x35c   :  { %v728_v62 = vsel %vm721_vm7, %v725_v53, 16  ;;  %v729_v0 = vsel %vm722_vm8, %v725_v53, 16  ;;  %v730_v4 = vsel %vm1250_vm9, %v725_v53, 16  ;;  %v731_v5 = vrot.slane %v727_v60, 7 }
 0x35d   :  { %v733_v6 = vrot.slane %v728_v62, 6  ;;  %v735_v41 = vrot.slane %v729_v0, 5  ;;  %v590_v7 = vrot.slane %v1233_v45, 4  ;;  %vm599_vm10 = vcmp.eq.f32.partialorder %v555_v34, %v589_v48 }
 0x35e   :  { %v603_v8 = vsel %vm1243_vm4, %v1216_v2, 16  ;;  %v604_v9 = vsel %vm599_vm10, %v1216_v2, 16  ;;  %v607_v10 = vsel %vm572_vm12, %v606_v3, %v601_v49  ;;  %v732_v11 = vsel %vm572_vm12, %v731_v5, %v726_v58 }
 0x35f   :  { %vm600_vm11 = vcmp.eq.f32.partialorder %v564_v37, %v590_v7  ;;  %v608_v12 = vrot.slane %v603_v8, 6  ;;  %v734_v13 = vsel %vm574_vm13, %v733_v6, %v732_v11  ;;  %v610_v15 = vrot.slane %v604_v9, 5 }
 0x360   :  { %v605_v14 = vsel %vm600_vm11, %v1216_v2, 16  ;;  %v736_v44 = vsel %vm576_vm14, %v735_v41, %v734_v13  ;;  %v737_v16 = vrot.slane %v730_v4, 4 }
 0x361   :  { %v609_v17 = vsel %vm574_vm13, %v608_v12, %v607_v10  ;;  %v612_v18 = vrot.slane %v605_v14, 4 }
 0x362   :  { %v611_v19 = vsel %vm576_vm14, %v610_v15, %v609_v17  ;;  %v738_v20 = vsel %vm578_vm15, %v737_v16, %v736_v44 }
 0x363   :  { %v613_v21 = vsel %vm578_vm15, %v612_v18, %v611_v19  ;;  %v739_v22 = vsel %vm704_vm0, %v738_v20, 2147483647 }
 0x364   :  { %v614_v23 = vsel %vm581_vm1, %v613_v21, 2147483647  ;;  %v741_v24 = vshra.s32 %v739_v22, 16  ;;  %v740_v27 = vand.u32 65535, %v739_v22 }
 0x365   :  { %v616_v59 = vshra.s32 %v614_v23, 16  ;;  %v615_v28 = vand.u32 65535, %v614_v23 }
 0x366   :  { %v743_v25 = vcvt.s32.f32 %v741_v24  ;;  %v742_v30 = vcvt.s32.f32 %v740_v27 }
 0x367   :  { %v618_v26 = vcvt.s32.f32 %v616_v59  ;;  %v617_v32 = vcvt.s32.f32 %v615_v28 }
 0x368   :  { %744 = vmin.xlane.f32.xlu0 %v743_v25 }
 0x369   :  { %619 = vmin.xlane.f32.xlu2 %v618_v26 }
 0x3db   :  { %v745_v29 = vpop.xlane.xlu0 %744 }
 0x3dc   :  { %v620_v31 = vpop.xlane.xlu2 %619  ;;  %vm746_vm12 = vcmp.eq.f32.partialorder %v743_v25, %v745_v29  ;;  %v751_v35 = vcvt.f32.s32 %v745_v29 }
 0x3dd   :  { %vm621_vm13 = vcmp.eq.f32.partialorder %v618_v26, %v620_v31  ;;  %v747_v33 = vsel %vm746_vm12, %v742_v30, inf  ;;  %v626_v34 = vcvt.f32.s32 %v620_v31 }
 0x3de   :  { %v622_v61 = vsel %vm621_vm13, %v617_v32, inf  ;;  %748 = vmin.xlane.f32.xlu0 %v747_v33  ;;  %v752_v63 = vshll.u32 %v751_v35, 16 }
 0x3df   :  { %623 = vmin.xlane.f32.xlu2 %v622_v61  ;;  %v627_v39 = vshll.u32 %v626_v34, 16 }
 0x3f7   :  { %755 = vrot.lane.b32.xlu2 %v1225_v40, %s1084_s12 }
 0x451   :  { %v749_v36 = vpop.xlane.xlu0 %748 }
 0x452   :  { %v624_v37 = vpop.xlane.xlu2 %623  ;;  %v750_v38 = vcvt.f32.s32 %v749_v36 }
 0x453   :  { %v625_v42 = vcvt.f32.s32 %v624_v37 }
 0x454   :  { %v753_v47 = vadd.s32 %v752_v63, %v750_v38 }
 0x455   :  { %v628_v46 = vadd.s32 %v627_v39, %v625_v42 }
 0x456   :  { %vm754_vm15 = vcmp.eq.s32.totalorder %v1216_v2, %v753_v47 }
 0x457   :  { %vm629_vm14 = vcmp.eq.s32.totalorder %v1216_v2, %v628_v46 }
 0x458   :  { %v630_v48 = vsel %vm629_vm14, -inf, %v1225_v40 }
 0x459   :  { %v631_v49 = vsel %vm581_vm1, %v630_v48, -inf }
 0x45a   :  { %v756_v50 = vpop.permute.xlu2 %755  ;;  %632 = vmax.xlane.f32.xlu0 %v631_v49 }
 0x45b   :  { %v758_v51 = vsel %vm754_vm15, -inf, %v756_v50 }
 0x45c   :  { %v759_v1 = vsel %vm581_vm1, %v758_v51, -inf }
 0x45d   :  { %760 = vmax.xlane.f32.xlu1 %v759_v1 }
 0x4cd   :  { %v1278_v53 = vpop.xlane.xlu0 %632 }
 0x4ce   :  { %vm635_vm0 = vcmp.eq.f32.partialorder %v630_v48, %v1278_v53 }
 0x4cf   :  { %v636_v54 = vsel %vm635_vm0, %v1216_v2, 16 }
 0x4d0   :  { %v1282_v55 = vpop.xlane.xlu1 %760  ;;  %v637_v40 = vsel %vm581_vm1, %v636_v54, 2147483647 }
 0x4d1   :  { %vm763_vm2 = vcmp.eq.f32.partialorder %v758_v51, %v1282_v55  ;;  %v639_v56 = vshra.s32 %v637_v40, 16  ;;  %v638_v0 = vand.u32 65535, %v637_v40 }
 0x4d2   :  { %v764_v3 = vsel %vm763_vm2, %v1216_v2, 16 }
 0x4d3   :  { %v641_v57 = vcvt.s32.f32 %v639_v56  ;;  %v765_v58 = vsel %vm581_vm1, %v764_v3, 2147483647  ;;  %v640_v5 = vcvt.s32.f32 %v638_v0 }
 0x4d4   :  { %v767_v60 = vshra.s32 %v765_v58, 16  ;;  %v766_v41 = vand.u32 65535, %v765_v58 }
 0x4d5   :  { %642 = vmin.xlane.f32.xlu0 %v641_v57 }
 0x4d6   :  { %v769_v62 = vcvt.s32.f32 %v767_v60  ;;  %v768_v8 = vcvt.s32.f32 %v766_v41 }
 0x4dd   :  { %770 = vmin.xlane.f32.xlu0 %v769_v62 }
 0x548   :  { %v643_v4 = vpop.xlane.xlu0 %642 }
 0x549   :  { %vm644_vm3 = vcmp.eq.f32.partialorder %v641_v57, %v643_v4  ;;  %v649_v10 = vcvt.f32.s32 %v643_v4 }
 0x54a   :  { %v645_v6 = vsel %vm644_vm3, %v640_v5, inf }
 0x54b   :  { %646 = vmin.xlane.f32.xlu2 %v645_v6  ;;  %v650_v12 = vshll.u32 %v649_v10, 16 }
 0x550   :  { %v771_v7 = vpop.xlane.xlu0 %770 }
 0x551   :  { %vm772_vm4 = vcmp.eq.f32.partialorder %v769_v62, %v771_v7  ;;  %v777_v15 = vcvt.f32.s32 %v771_v7 }
 0x552   :  { %v773_v9 = vsel %vm772_vm4, %v768_v8, inf  ;;  %vm832_vm4 = vcmask 7168  }
 0x553   :  { %774 = vmin.xlane.f32.xlu0 %v773_v9  ;;  %v778_v18 = vshll.u32 %v777_v15, 16 }
 0x5be   :  { %v647_v11 = vpop.xlane.xlu2 %646 }
 0x5bf   :  { %v648_v13 = vcvt.f32.s32 %v647_v11 }
 0x5c1   :  { %v651_v14 = vadd.s32 %v650_v12, %v648_v13 }
 0x5c3   :  { %vm652_vm5 = vcmp.eq.s32.totalorder %v1216_v2, %v651_v14 }
 0x5c4   :  { %v653_v44 = vsel %vm652_vm5, -inf, %v630_v48  ;;  %vm842_vm5 = vcmask 15360  }
 0x5c5   :  { %v654_v16 = vsel %vm581_vm1, %v653_v44, -inf }
 0x5c6   :  { %v775_v17 = vpop.xlane.xlu0 %774  ;;  %655 = vmax.xlane.f32.xlu0 %v654_v16 }
 0x5c7   :  { %v776_v19 = vcvt.f32.s32 %v775_v17 }
 0x5c9   :  { %v779_v20 = vadd.s32 %v778_v18, %v776_v19 }
 0x5cb   :  { %vm780_vm6 = vcmp.eq.s32.totalorder %v1216_v2, %v779_v20 }
 0x5cc   :  { %v781_v21 = vsel %vm780_vm6, -inf, %v758_v51  ;;  %vm871_vm6 = vcmask 33792  }
 0x5cd   :  { %v782_v22 = vsel %vm581_vm1, %v781_v21, -inf }
 0x5ce   :  { %783 = vmax.xlane.f32.xlu0 %v782_v22 }
 0x639   :  { %v1292_v23 = vpop.xlane.xlu0 %655 }
 0x63a   :  { %vm658_vm7 = vcmp.eq.f32.partialorder %v653_v44, %v1292_v23 }
 0x63b   :  { %v659_v24 = vsel %vm658_vm7, %v1216_v2, 16 }
 0x63c   :  { %v660_v59 = vsel %vm581_vm1, %v659_v24, 2147483647 }
 0x63d   :  { %v662_v25 = vshra.s32 %v660_v59, 16  ;;  %v661_v32 = vand.u32 65535, %v660_v59 }
 0x63f   :  { %v664_v26 = vcvt.s32.f32 %v662_v25  ;;  %v663_v61 = vcvt.s32.f32 %v661_v32 }
 0x641   :  { %665 = vmin.xlane.f32.xlu1 %v664_v26  ;;  %v1297_v27 = vpop.xlane.xlu0 %783 }
 0x642   :  { %vm786_vm8 = vcmp.eq.f32.partialorder %v781_v21, %v1297_v27 }
 0x643   :  { %v787_v28 = vsel %vm786_vm8, %v1216_v2, 16 }
 0x644   :  { %v788_v29 = vsel %vm581_vm1, %v787_v28, 2147483647 }
 0x645   :  { %v790_v30 = vshra.s32 %v788_v29, 16  ;;  %v789_v35 = vand.u32 65535, %v788_v29 }
 0x647   :  { %v792_v31 = vcvt.s32.f32 %v790_v30  ;;  %v791_v37 = vcvt.s32.f32 %v789_v35  ;;  %v634_v30 = vadd.f32 %v1278_v53, %v1233_v45  ;;  %v1085_v53 = vmov 0.0  }
 0x649   :  { %793 = vmin.xlane.f32.xlu0 %v792_v31  ;;  %v657_v32 = vadd.f32 %v1292_v23, %v634_v30 }
 0x6b4   :  { %v666_v33 = vpop.xlane.xlu1 %665 }
 0x6b5   :  { %vm667_vm9 = vcmp.eq.f32.partialorder %v664_v26, %v666_v33  ;;  %v672_v39 = vcvt.f32.s32 %v666_v33 }
 0x6b6   :  { %v668_v34 = vsel %vm667_vm9, %v663_v61, inf  ;;  %v835_v61 = vshrl.u32 %v565_v52, 7  ;;  %v869_v52 = vstv %s839_s14 }
 0x6b7   :  { %669 = vmin.xlane.f32.xlu1 %v668_v34  ;;  %v673_v63 = vshll.u32 %v672_v39, 16 }
 0x6bc   :  { %v794_v36 = vpop.xlane.xlu0 %793 }
 0x6bd   :  { %vm795_vm10 = vcmp.eq.f32.partialorder %v792_v31, %v794_v36  ;;  %v800_v48 = vcvt.f32.s32 %v794_v36  ;;  %v762_v31 = vadd.f32 %v1282_v55, %v1231_v43  ;;  %v841_v55 = vstv %s903_s13 }
 0x6be   :  { %v796_v38 = vsel %vm795_vm10, %v791_v37, inf }
 0x6bf   :  { %797 = vmin.xlane.f32.xlu0 %v796_v38  ;;  %v801_v1 = vshll.u32 %v800_v48, 16  ;;  %v785_v33 = vadd.f32 %v1297_v27, %v762_v31 }
 0x72a   :  { %v670_v42 = vpop.xlane.xlu1 %669 }
 0x72b   :  { %v671_v46 = vcvt.f32.s32 %v670_v42 }
 0x72d   :  { %v674_v47 = vadd.s32 %v673_v63, %v671_v46 }
 0x72f   :  { %vm675_vm11 = vcmp.eq.s32.totalorder %v1216_v2, %v674_v47 }
 0x730   :  { %v676_v49 = vsel %vm675_vm11, -inf, %v653_v44 }
 0x731   :  { %v677_v50 = vsel %vm581_vm1, %v676_v49, -inf }
 0x732   :  { %678 = vmax.xlane.f32.xlu2 %v677_v50  ;;  %v798_v51 = vpop.xlane.xlu0 %797 }
 0x733   :  { %v799_v54 = vcvt.f32.s32 %v798_v51 }
 0x735   :  { %v802_v40 = vadd.s32 %v801_v1, %v799_v54 }
 0x737   :  { %vm803_vm12 = vcmp.eq.s32.totalorder %v1216_v2, %v802_v40 }
 0x738   :  { %v804_v56 = vsel %vm803_vm12, -inf, %v781_v21 }
 0x739   :  { %v805_v3 = vsel %vm581_vm1, %v804_v56, -inf }
 0x73a   :  { %806 = vmax.xlane.f32.xlu1 %v805_v3 }
 0x7a5   :  { %v679_v57 = vpop.xlane.xlu2 %678 }
 0x7a6   :  { %vm681_vm13 = vcmp.eq.f32.partialorder %v676_v49, %v679_v57  ;;  %v680_v35 = vadd.f32 %v679_v57, %v657_v32 }
 0x7a7   :  { %v682_v58 = vsel %vm681_vm13, %v1216_v2, 16 }
 0x7a8   :  { %v683_v60 = vsel %vm581_vm1, %v682_v58, 2147483647 }
 0x7a9   :  { %v685_v62 = vshra.s32 %v683_v60, 16  ;;  %v684_v8 = vand.u32 65535, %v683_v60 }
 0x7ab   :  { %v687_v0 = vcvt.s32.f32 %v685_v62  ;;  %v686_v10 = vcvt.s32.f32 %v684_v8 }
 0x7ad   :  { %688 = vmin.xlane.f32.xlu0 %v687_v0  ;;  %v807_v4 = vpop.xlane.xlu1 %806 }
 0x7ae   :  { %vm809_vm14 = vcmp.eq.f32.partialorder %v804_v56, %v807_v4  ;;  %v808_v36 = vadd.f32 %v807_v4, %v785_v33 }
 0x7af   :  { %v810_v5 = vsel %vm809_vm14, %v1216_v2, 16 }
 0x7b0   :  { %v811_v6 = vsel %vm581_vm1, %v810_v5, 2147483647 }
 0x7b1   :  { %v813_v41 = vshra.s32 %v811_v6, 16  ;;  %v812_v12 = vand.u32 65535, %v811_v6 }
 0x7b3   :  { %v815_v7 = vcvt.s32.f32 %v813_v41  ;;  %v814_v14 = vcvt.s32.f32 %v812_v12 }
 0x7b5   :  { %816 = vmin.xlane.f32.xlu2 %v815_v7 }
 0x820   :  { %v689_v9 = vpop.xlane.xlu0 %688 }
 0x821   :  { %vm690_vm15 = vcmp.eq.f32.partialorder %v687_v0, %v689_v9  ;;  %v695_v44 = vcvt.f32.s32 %v689_v9 }
 0x822   :  { %v691_v11 = vsel %vm690_vm15, %v686_v10, inf }
 0x823   :  { %692 = vmin.xlane.f32.xlu1 %v691_v11  ;;  %v696_v17 = vshll.u32 %v695_v44, 16 }
 0x828   :  { %v817_v13 = vpop.xlane.xlu2 %816 }
 0x829   :  { %vm818_vm0 = vcmp.eq.f32.partialorder %v815_v7, %v817_v13  ;;  %v823_v20 = vcvt.f32.s32 %v817_v13 }
 0x82a   :  { %v819_v15 = vsel %vm818_vm0, %v814_v14, inf }
 0x82b   :  { %820 = vmin.xlane.f32.xlu0 %v819_v15  ;;  %v824_v59 = vshll.u32 %v823_v20, 16 }
 0x896   :  { %v693_v16 = vpop.xlane.xlu1 %692 }
 0x897   :  { %v694_v18 = vcvt.f32.s32 %v693_v16 }
 0x899   :  { %v697_v19 = vadd.s32 %v696_v17, %v694_v18 }
 0x89b   :  { %vm698_vm2 = vcmp.eq.s32.totalorder %v1216_v2, %v697_v19 }
 0x89c   :  { %v699_v21 = vsel %vm698_vm2, -inf, %v676_v49 }
 0x89d   :  { %v700_v22 = vsel %vm581_vm1, %v699_v21, -inf }
 0x89e   :  { %701 = vmax.xlane.f32.xlu2 %v700_v22  ;;  %v821_v24 = vpop.xlane.xlu0 %820 }
 0x89f   :  { %v822_v25 = vcvt.f32.s32 %v821_v24 }
 0x8a1   :  { %v825_v26 = vadd.s32 %v824_v59, %v822_v25 }
 0x8a3   :  { %vm826_vm3 = vcmp.eq.s32.totalorder %v1216_v2, %v825_v26 }
 0x8a4   :  { %v827_v28 = vsel %vm826_vm3, -inf, %v804_v56 }
 0x8a5   :  { %v828_v29 = vsel %vm581_vm1, %v827_v28, -inf  ;;  %vm836_vm1 = vcmp.eq.s32.totalorder %v835_v61, %v1216_v2 }
 0x8a6   :  { %829 = vmax.xlane.f32.xlu1 %v828_v29  ;;  %v902_v43 = vsel %vm836_vm1, 1.0, %v1085_v53 }
 0x911   :  { %v702_v34 = vpop.xlane.xlu2 %701 }
 0x912   :  { %v703_v38 = vadd.f32 %v702_v34, %v680_v35 }
 0x919   :  { %v830_v37 = vpop.xlane.xlu1 %829 }
 0x91a   :  { %v831_v39 = vadd.f32 %v830_v37, %v808_v36 }
 0x91c   :  { %v833_v45 = vsel %vm832_vm4, %v703_v38, %v831_v39 }
 0x91d   :  { %904 = vmatpush.xpose.msk.msrb.mxu3 %vm842_vm5, %v833_v45 }
 0x920   :  { %905 = vmatmul.msk.f32.vlgmr.msrb.gmra.mxu3 %vm842_vm5, %v902_v43 }
 0x9a3   :  { %v866_v23 = vpop.f32.mrf.mxu3 }
 0x9a4   :  { %v867_v27 = vadd.f32 %v866_v23, %v841_v55 }
 0x9a6   :  { %v870_v42 = vmul.f32 %v869_v52, %v867_v27 }
 0x9a8   :  { %872 = vst.msk [vmem:[#allocation10] sm:$0x3] %vm871_vm6, %v870_v42 }
 0x9a9   :  { %883 = dma.vmem_to_hbm [thread:$0]  %s879_s16, 32, %s881_s19, [#allocation4]  }
 0x9aa   :  { %1075 = dma.done.wait [#allocation4], 32  }
 0x9ab   :  { %1076 = vsyncadd [#allocation4], 4294967264 }
 0x9ac   :  { %888 = vsyncpa [#allocation3], 1 }
 0x9ad   :  { %889 = vsyncpa [#allocation7], 1 }
 0x9ae   :  { %890 = vsyncpa [#allocation4], 1 }
 0x9af   :  { %891 = vsyncpa [#allocation5], 1 }

</bundles_post_ra>
